<compile_context>
chip_gen: v7x
topology: tpu7x:2x2x1
jax: 0.10.0
libtpu: 0.0.40
codegen_flags: <defaults>
</compile_context>

<pallas_src>
import functools

import jax
import jax.numpy as jnp
from jax.experimental import pallas as pl
from jax.experimental.pallas import tpu as pltpu

_LANE = 128
_MAX_TILE = 1024  # lanes per grid step; 2*1024*4B per buffer -> trivial VMEM


def _round_up(n, m):
    return ((n + m - 1) // m) * m


def _sigmoid(v):
    # exp goes to the EUP; exact reciprocal keeps us bit-close to the
    # reference (approx=True would also pass at ~1e-4 tolerance).
    return pl.reciprocal(1.0 + jnp.exp(-v), approx=False)


def _forward_kernel(p_ref, x_ref, o_ref):
    """z = alpha * sigmoid(M2 @ relu(M1 @ x + c1) + c2), batch on lanes."""
    x0 = x_ref[0:1, :].astype(jnp.float32)   # (1, TN) feature 0 across batch
    x1 = x_ref[1:2, :].astype(jnp.float32)   # (1, TN) feature 1 across batch

    # stage 1: folded affine (C.linear o B o A) + relu
    h0 = jnp.maximum(p_ref[0] * x0 + p_ref[1] * x1 + p_ref[4], 0.0)
    h1 = jnp.maximum(p_ref[2] * x0 + p_ref[3] * x1 + p_ref[5], 0.0)

    # stage 2: folded affine (D.b.l1 o D.b.a) + sigmoid, scaled by alpha
    g0 = p_ref[6] * h0 + p_ref[7] * h1 + p_ref[10]
    g1 = p_ref[8] * h0 + p_ref[9] * h1 + p_ref[11]
    alpha = p_ref[12]
    z0 = alpha * _sigmoid(g0)
    z1 = alpha * _sigmoid(g1)

    o_ref[...] = jnp.concatenate([z0, z1], axis=0).astype(o_ref.dtype)


def _reverse_kernel(p_ref, x_ref, o_ref):
    """z = M3 @ relu(M2 @ sigmoid(M1 @ x + c1) + c2) + c3 (alpha in M3/c3)."""
    x0 = x_ref[0:1, :].astype(jnp.float32)
    x1 = x_ref[1:2, :].astype(jnp.float32)

    # stage 1: folded affine (D.b.l1 o D.b.a) + sigmoid
    h0 = _sigmoid(p_ref[0] * x0 + p_ref[1] * x1 + p_ref[4])
    h1 = _sigmoid(p_ref[2] * x0 + p_ref[3] * x1 + p_ref[5])

    # stage 2: C.linear + relu
    g0 = jnp.maximum(p_ref[6] * h0 + p_ref[7] * h1 + p_ref[10], 0.0)
    g1 = jnp.maximum(p_ref[8] * h0 + p_ref[9] * h1 + p_ref[11], 0.0)

    # stage 3: folded affine (alpha * (A o B))
    z0 = p_ref[12] * g0 + p_ref[13] * g1 + p_ref[16]
    z1 = p_ref[14] * g0 + p_ref[15] * g1 + p_ref[17]

    o_ref[...] = jnp.concatenate([z0, z1], axis=0).astype(o_ref.dtype)


def _compose(w2, b2, w1, b1):
    """L2 o L1 for column-vector affine maps y = W v + b."""
    return w2 @ w1, w2 @ b1 + b2


def _fold_params(params, reverse):
    """Trace-time folding of the static layer chain into 2-3 affine stages.

    Weights stay in PyTorch (out, in) layout; column-vector math y = W v + b
    consumes them directly, so no per-call transposes are needed.
    """
    wa, ba = params["a_w"], params["a_b"]
    wba, bba = params["b_a_w"], params["b_a_b"]
    wbl, bbl = params["b_l1_w"], params["b_l1_b"]
    wc, bc = params["c_w"], params["c_b"]
    wdba, bdba = params["d_b_a_w"], params["d_b_a_b"]
    wdl, bdl = params["d_b_l1_w"], params["d_b_l1_b"]
    alpha = params["alpha"]

    mb, cb = _compose(wbl, bbl, wba, bba)    # B  = b.l1 o b.a
    md, cd = _compose(wdl, bdl, wdba, bdba)  # D's linear chain

    if not reverse:
        m1, c1 = _compose(mb, cb, wa, ba)    # B o A
        m1, c1 = _compose(wc, bc, m1, c1)    # C.linear o B o A   (pre-relu)
        m2, c2 = md, cd                      # pre-sigmoid
        packed = jnp.concatenate(
            [m1.reshape(-1), c1, m2.reshape(-1), c2, alpha.reshape(1)])
    else:
        m1, c1 = md, cd                      # pre-sigmoid (D)
        m2, c2 = wc, bc                      # pre-relu    (C.linear)
        m3, c3 = _compose(wa, ba, mb, cb)    # A o B
        m3, c3 = alpha * m3, alpha * c3      # fold the alpha scale in
        packed = jnp.concatenate(
            [m1.reshape(-1), c1, m2.reshape(-1), c2, m3.reshape(-1), c3])
    return packed.astype(jnp.float32)


@functools.partial(jax.jit, static_argnames=("case",))
def main_with_non_tensor_input(x, params, case: str = "forward"):
    reverse = (case == "reverse")
    n, f = x.shape
    assert f == 2, "MainWithNonTensorInput operates on 2-feature inputs"

    packed = _fold_params(params, reverse)

    # Batch on the lane axis, padded to a lane-dense multiple of 128.
    x_t = jnp.transpose(x)                               # (2, N)
    n_pad = _round_up(max(n, 1), _LANE)
    tile = min(n_pad, _MAX_TILE)
    n_pad = _round_up(n_pad, tile)
    if n_pad != n:
        x_t = jnp.pad(x_t, ((0, 0), (0, n_pad - n)))

    kernel = _reverse_kernel if reverse else _forward_kernel

    out_t = pl.pallas_call(
        kernel,
        out_shape=jax.ShapeDtypeStruct((2, n_pad), x.dtype),
        grid=(n_pad // tile,),
        in_specs=[
            pl.BlockSpec(memory_space=pltpu.MemorySpace.SMEM),  # packed params
            pl.BlockSpec((2, tile), lambda i: (0, i)),          # x batch tile
        ],
        out_specs=pl.BlockSpec((2, tile), lambda i: (0, i)),
        compiler_params=pltpu.CompilerParams(
            dimension_semantics=("parallel",)),
    )(packed, x_t)

    return jnp.transpose(out_t[:, :n])


def init_params(key):
    """Deterministic parameter init, PyTorch layout: W (out,in), b (out,)."""
    names = ["a", "b_a", "b_l1", "c", "d_b_a", "d_b_l1"]
    params = {}
    for i, name in enumerate(names):
        kw, kb = jax.random.split(jax.random.fold_in(key, i))
        params[name + "_w"] = jax.random.normal(kw, (2, 2), jnp.float32) * 0.5
        params[name + "_b"] = jax.random.normal(kb, (2,), jnp.float32) * 0.1
    params["alpha"] = jnp.array(0.941736, jnp.float32)
    return params


def _reference(x, params, case):
    """Pure-JAX mirror of the PyTorch module (unfolded)."""
    def lin(v, w, b):
        return v @ w.T + b

    def mod_a(v):
        return lin(v, params["a_w"], params["a_b"])

    def mod_b(v):
        return lin(lin(v, params["b_a_w"], params["b_a_b"]),
                   params["b_l1_w"], params["b_l1_b"])

    def mod_c(v):
        return jax.nn.relu(lin(v, params["c_w"], params["c_b"]))

    def mod_d(v):
        return jax.nn.sigmoid(
            lin(lin(v, params["d_b_a_w"], params["d_b_a_b"]),
                params["d_b_l1_w"], params["d_b_l1_b"]))

    if case == "reverse":
        return params["alpha"] * mod_a(mod_b(mod_c(mod_d(x))))
    return params["alpha"] * mod_d(mod_c(mod_b(mod_a(x))))


if __name__ == "__main__":
    key = jax.random.PRNGKey(0)
    kx, kp = jax.random.split(key)

    # Batch of 2-feature rows (non-multiple of 128 to exercise lane padding).
    x = jax.random.normal(kx, (300, 2), jnp.float32)
    params = init_params(kp)

    out_fwd = main_with_non_tensor_input(x, params, case="forward")
    out_rev = main_with_non_tensor_input(x, params, case="reverse")
    jax.block_until_ready((out_fwd, out_rev))

    ref_fwd = _reference(x, params, "forward")
    ref_rev = _reference(x, params, "reverse")
    assert out_fwd.shape == x.shape and out_rev.shape == x.shape
    assert jnp.allclose(out_fwd, ref_fwd, atol=1e-5, rtol=1e-5)
    assert jnp.allclose(out_rev, ref_rev, atol=1e-5, rtol=1e-5)

    print("KERNEL_OK")
</pallas_src>

<mosaic_0001>
module attributes {stable_mosaic.version = 11 : i64} {
  func.func @_forward_kernel(%arg0: i32, %arg1: memref<13xf32, #tpu.memory_space<smem>>, %arg2: memref<2x384xf32, #tpu.memory_space<vmem>>, %arg3: memref<2x384xf32, #tpu.memory_space<vmem>>) attributes {dimension_semantics = [#tpu.dimension_semantics<parallel>], iteration_bounds = array<i64: 1>, scalar_prefetch = 0 : i64, scratch_operands = 0 : i64, tpu.core_type = #tpu.core_type<tc>, window_params = [{transform_indices = @transform_0, window_bounds = array<i64: 13>}, {transform_indices = @transform_1, window_bounds = array<i64: 2, 384>}, {transform_indices = @transform_2, window_bounds = array<i64: 2, 384>}]} {
    %c0 = arith.constant 0 : index
    %c0_0 = arith.constant 0 : index
    %0 = vector.load %arg2[%c0, %c0_0] : memref<2x384xf32, #tpu.memory_space<vmem>>, vector<1x384xf32>
    %c1 = arith.constant 1 : index
    %c0_1 = arith.constant 0 : index
    %1 = vector.load %arg2[%c1, %c0_1] : memref<2x384xf32, #tpu.memory_space<vmem>>, vector<1x384xf32>
    %c0_2 = arith.constant 0 : index
    %2 = memref.load %arg1[%c0_2] : memref<13xf32, #tpu.memory_space<smem>>
    %3 = vector.broadcast %2 : f32 to vector<1x384xf32>
    %4 = arith.mulf %3, %0 : vector<1x384xf32>
    %c1_3 = arith.constant 1 : index
    %5 = memref.load %arg1[%c1_3] : memref<13xf32, #tpu.memory_space<smem>>
    %6 = vector.broadcast %5 : f32 to vector<1x384xf32>
    %7 = arith.mulf %6, %1 : vector<1x384xf32>
    %8 = arith.addf %4, %7 : vector<1x384xf32>
    %c4 = arith.constant 4 : index
    %9 = memref.load %arg1[%c4] : memref<13xf32, #tpu.memory_space<smem>>
    %10 = vector.broadcast %9 : f32 to vector<1x384xf32>
    %11 = arith.addf %8, %10 : vector<1x384xf32>
    %cst = arith.constant 0.000000e+00 : f32
    %12 = vector.broadcast %cst : f32 to vector<1x384xf32>
    %13 = arith.maximumf %11, %12 : vector<1x384xf32>
    %c2 = arith.constant 2 : index
    %14 = memref.load %arg1[%c2] : memref<13xf32, #tpu.memory_space<smem>>
    %15 = vector.broadcast %14 : f32 to vector<1x384xf32>
    %16 = arith.mulf %15, %0 : vector<1x384xf32>
    %c3 = arith.constant 3 : index
    %17 = memref.load %arg1[%c3] : memref<13xf32, #tpu.memory_space<smem>>
    %18 = vector.broadcast %17 : f32 to vector<1x384xf32>
    %19 = arith.mulf %18, %1 : vector<1x384xf32>
    %20 = arith.addf %16, %19 : vector<1x384xf32>
    %c5 = arith.constant 5 : index
    %21 = memref.load %arg1[%c5] : memref<13xf32, #tpu.memory_space<smem>>
    %22 = vector.broadcast %21 : f32 to vector<1x384xf32>
    %23 = arith.addf %20, %22 : vector<1x384xf32>
    %cst_4 = arith.constant 0.000000e+00 : f32
    %24 = vector.broadcast %cst_4 : f32 to vector<1x384xf32>
    %25 = arith.maximumf %23, %24 : vector<1x384xf32>
    %c6 = arith.constant 6 : index
    %26 = memref.load %arg1[%c6] : memref<13xf32, #tpu.memory_space<smem>>
    %27 = vector.broadcast %26 : f32 to vector<1x384xf32>
    %28 = arith.mulf %27, %13 : vector<1x384xf32>
    %c7 = arith.constant 7 : index
    %29 = memref.load %arg1[%c7] : memref<13xf32, #tpu.memory_space<smem>>
    %30 = vector.broadcast %29 : f32 to vector<1x384xf32>
    %31 = arith.mulf %30, %25 : vector<1x384xf32>
    %32 = arith.addf %28, %31 : vector<1x384xf32>
    %c10 = arith.constant 10 : index
    %33 = memref.load %arg1[%c10] : memref<13xf32, #tpu.memory_space<smem>>
    %34 = vector.broadcast %33 : f32 to vector<1x384xf32>
    %35 = arith.addf %32, %34 : vector<1x384xf32>
    %c8 = arith.constant 8 : index
    %36 = memref.load %arg1[%c8] : memref<13xf32, #tpu.memory_space<smem>>
    %37 = vector.broadcast %36 : f32 to vector<1x384xf32>
    %38 = arith.mulf %37, %13 : vector<1x384xf32>
    %c9 = arith.constant 9 : index
    %39 = memref.load %arg1[%c9] : memref<13xf32, #tpu.memory_space<smem>>
    %40 = vector.broadcast %39 : f32 to vector<1x384xf32>
    %41 = arith.mulf %40, %25 : vector<1x384xf32>
    %42 = arith.addf %38, %41 : vector<1x384xf32>
    %c11 = arith.constant 11 : index
    %43 = memref.load %arg1[%c11] : memref<13xf32, #tpu.memory_space<smem>>
    %44 = vector.broadcast %43 : f32 to vector<1x384xf32>
    %45 = arith.addf %42, %44 : vector<1x384xf32>
    %c12 = arith.constant 12 : index
    %46 = memref.load %arg1[%c12] : memref<13xf32, #tpu.memory_space<smem>>
    %cst_5 = arith.constant 0.000000e+00 : f32
    %47 = vector.broadcast %cst_5 : f32 to vector<1x384xf32>
    %48 = arith.subf %47, %35 : vector<1x384xf32>
    %49 = math.exp %48 : vector<1x384xf32>
    %cst_6 = arith.constant 1.000000e+00 : f32
    %50 = vector.broadcast %cst_6 : f32 to vector<1x384xf32>
    %51 = arith.addf %50, %49 : vector<1x384xf32>
    %52 = tpu.reciprocal %51 : vector<1x384xf32> -> vector<1x384xf32>
    %53 = vector.broadcast %46 : f32 to vector<1x384xf32>
    %54 = arith.mulf %53, %52 : vector<1x384xf32>
    %cst_7 = arith.constant 0.000000e+00 : f32
    %55 = vector.broadcast %cst_7 : f32 to vector<1x384xf32>
    %56 = arith.subf %55, %45 : vector<1x384xf32>
    %57 = math.exp %56 : vector<1x384xf32>
    %cst_8 = arith.constant 1.000000e+00 : f32
    %58 = vector.broadcast %cst_8 : f32 to vector<1x384xf32>
    %59 = arith.addf %58, %57 : vector<1x384xf32>
    %60 = tpu.reciprocal %59 : vector<1x384xf32> -> vector<1x384xf32>
    %61 = vector.broadcast %46 : f32 to vector<1x384xf32>
    %62 = arith.mulf %61, %60 : vector<1x384xf32>
    %63 = tpu.concatenate %54, %62 in 0 : vector<1x384xf32>, vector<1x384xf32> -> vector<2x384xf32>
    %c0_9 = arith.constant 0 : index
    %c0_10 = arith.constant 0 : index
    %64 = vector.load %arg3[%c0_9, %c0_10] : memref<2x384xf32, #tpu.memory_space<vmem>>, vector<2x384xf32>
    tpu.vector_store %arg3[%c0_9, %c0_10], %63 {strides = array<i32>} : memref<2x384xf32, #tpu.memory_space<vmem>>, vector<2x384xf32>,
    return
  }
  func.func @transform_0(%arg0: i32) -> i32 {
    %c0_i32 = arith.constant 0 : i32
    %c0_i32_0 = arith.constant 0 : i32
    return %c0_i32 : i32
  }
  func.func @transform_1(%arg0: i32) -> (i32, i32) {
    %c0_i32 = arith.constant 0 : i32
    %c0_i32_0 = arith.constant 0 : i32
    return %c0_i32, %arg0 : i32, i32
  }
  func.func @transform_2(%arg0: i32) -> (i32, i32) {
    %c0_i32 = arith.constant 0 : i32
    %c0_i32_0 = arith.constant 0 : i32
    return %c0_i32, %arg0 : i32, i32
  }
}

</mosaic_0001>

<bundles_post_ra>
// kernel: main_with_non_tensor_input.1
= control target key start
LH: loop header
LB: loop body
LE: loop exit
PB: predicated region body
PF: predicated region fallthrough
CT: control target
= control target key end

     0   :  { %7 = vsyncpa [#allocation3], 0  ;;  %s211_s0 = inlined_call_operand.vmem [shape: f32[13], index: 0, kind: input, shape index: {}]   ;;  %s212_s1 = inlined_call_operand.vmem [shape: f32[2,384], index: 1, kind: input, shape index: {}]   ;;  %s213_s2 = inlined_call_operand.vmem [shape: f32[2,384], index: 2, kind: output, shape index: {}]  }
   0x1   :  { %s14_s11 = sshll.u32 %s211_s0, 4  ;;  %s15_s11 = int_to_ptr.vmem [resolvable:$true] %s14_s11 }
   0x2   :  { %s168_s12 = scalar_lea.vmem %s15_s11, 16  ;;  %p173_p1 = scmp.lt.s32.totalorder %s15_s11, %s15_s11 }
   0x3   :  { %p169_p0 = scmp.ne.s32.totalorder %s15_s11, %s168_s12  ;;  %p174_p2 = scmp.lt.s32.totalorder %s168_s12, %s168_s12 }
   0x5   :  { %p175_p3 = por %p174_p2, %p173_p1 }
   0x7   :  { %p176_p4 = pnand %p175_p3, %p169_p0 }
   0x9   :  { %179 = shalt.err (!%p176_p4)
}
   0xa   :  { %s182_s13 = smov [#allocation2]  }
   0xb   :  { %17 = dma.vmem_to_smem %s15_s11, 16, %s182_s13, [#allocation3]  }
   0xc   :  { %180 = dma.done.wait [#allocation3], 16  }
   0xd   :  { %181 = vsyncadd [#allocation3], 4294967280 }
   0xe   :  { %23 = sfence }
   0xf   :  { %s27_s14 = sld [smem:[#allocation2]]  ;;  %s146_s15 = sld [smem:[#allocation2 + $0x1]]  ;;  %v24_v0 = vld [vmem:[%s212_s1] ss:$2 sm:$0x7]  ;;  %v84_v40 = vlaneseq  ;;  %vm115_vm0 = vcmask 1040384  }
  0x10   :  { %s147_s16 = sld [smem:[#allocation2 + $0x4]]  ;;  %s148_s17 = sld [smem:[#allocation2 + $0x2]]  ;;  %v145_v1 = vld [vmem:[%s212_s1 + $0x1] ss:$2 sm:$0x7] }
  0x11   :  { %s149_s18 = sld [smem:[#allocation2 + $0x3]]  ;;  %s150_s19 = sld [smem:[#allocation2 + $0x5]]  ;;  %v85_v41 = vshrl.u32 %v84_v40, 7  ;;  %v183_v42 = vmov 1983009808  }
  0x12   :  { %s151_s23 = sld [smem:[#allocation2 + $0x6]]  ;;  %s154_s24 = sld [smem:[#allocation2 + $0x8]]  ;;  %v124_v43 = vunpack.c.l.s4 %v183_v42 }
  0x13   :  { %s152_s25 = sld [smem:[#allocation2 + $0x7]]  ;;  %s155_s26 = sld [smem:[#allocation2 + $0x9]]  ;;  %v86_v45 = vsub.s32 0, %v85_v41  ;;  %v90_v46 = vsub.s32 1, %v85_v41  ;;  %v94_v47 = vsub.s32 2, %v85_v41 }
  0x14   :  { %s153_s27 = sld [smem:[#allocation2 + $0xa]]  ;;  %s156_s28 = sld [smem:[#allocation2 + $0xb]]  ;;  %v125_v48 = vunpack.c.0.s8 %v124_v43 }
  0x15   :  { %v28_v2 = vstv %s27_s14  ;;  %v31_v3 = vstv %s146_s15  ;;  %s157_s1 = sld [smem:[#allocation2 + $0xc]] }
  0x16   :  { %v29_v4 = vmul.f32 %v28_v2, %v24_v0  ;;  %v32_v5 = vmul.f32 %v145_v1, %v31_v3  ;;  %v39_v6 = vstv %s148_s17  ;;  %v35_v7 = vstv %s147_s16 }
  0x17   :  { %v40_v8 = vmul.f32 %v39_v6, %v24_v0  ;;  %v42_v9 = vstv %s149_s18  ;;  %v46_v12 = vstv %s150_s19  ;;  %v128_v56 = vsub.s32 %v125_v48, %v85_v41 }
  0x18   :  { %v33_v10 = vadd.f32 %v32_v5, %v29_v4  ;;  %v43_v11 = vmul.f32 %v145_v1, %v42_v9  ;;  %v50_v15 = vstv %s151_s23  ;;  %v60_v16 = vstv %s154_s24 }
  0x19   :  { %v53_v19 = vstv %s152_s25  ;;  %v63_v20 = vstv %s155_s26 }
  0x1a   :  { %v36_v13 = vadd.f32 %v35_v7, %v33_v10  ;;  %v44_v14 = vadd.f32 %v43_v11, %v40_v8  ;;  %v57_v26 = vstv %s153_s27  ;;  %v67_v27 = vstv %s156_s28 }
  0x1b   :  { %v75_v44 = vstv %s157_s1 }
  0x1c   :  { %v37_v17 = vmax.f32 %v36_v13, 0.0  ;;  %v47_v18 = vadd.f32 %v46_v12, %v44_v14 }
  0x1e   :  { %v48_v21 = vmax.f32 %v47_v18, 0.0  ;;  %v51_v22 = vmul.f32 %v50_v15, %v37_v17  ;;  %v61_v23 = vmul.f32 %v60_v16, %v37_v17 }
  0x20   :  { %v54_v24 = vmul.f32 %v53_v19, %v48_v21  ;;  %v64_v25 = vmul.f32 %v63_v20, %v48_v21 }
  0x22   :  { %v55_v28 = vadd.f32 %v54_v24, %v51_v22  ;;  %v65_v29 = vadd.f32 %v64_v25, %v61_v23 }
  0x24   :  { %v58_v30 = vadd.f32 %v57_v26, %v55_v28  ;;  %v68_v31 = vadd.f32 %v67_v27, %v65_v29 }
  0x26   :  { %v70_v32 = vsub.f32 0.0, %v58_v30  ;;  %v77_v33 = vsub.f32 0.0, %v68_v31 }
  0x28   :  { %v71_v34 = vmul.f32 1.442695, %v70_v32  ;;  %v78_v35 = vmul.f32 1.442695, %v77_v33 }
  0x2a   :  { %160 = vpow2.f32 %v71_v34 }
  0x2b   :  { %162 = vpow2.f32 %v78_v35 }
  0x34   :  { %v161_v36 = vpop.eup %160 }
  0x35   :  { %v163_v37 = vpop.eup %162  ;;  %v73_v38 = vadd.f32 1.0, %v161_v36 }
  0x36   :  { %v80_v39 = vadd.f32 1.0, %v163_v37 }
  0x37   :  { %164 = vrcp.f32 %v73_v38 }
  0x38   :  { %166 = vrcp.f32 %v80_v39 }
  0x41   :  { %v165_v49 = vpop.eup %164 }
  0x42   :  { %v167_v50 = vpop.eup %166  ;;  %v76_v51 = vmul.f32 %v165_v49, %v75_v44 }
  0x43   :  { %v82_v52 = vmul.f32 %v167_v50, %v75_v44 }
  0x44   :  { %v87_v53 = vrot.slane %v76_v51, %v86_v45  ;;  %v91_v54 = vrot.slane %v76_v51, %v90_v46  ;;  %v95_v55 = vrot.slane %v76_v51, %v94_v47 }
  0x45   :  { %v103_v57 = vrot.slane %v82_v52, %v86_v45  ;;  %v107_v58 = vrot.slane %v82_v52, %v90_v46  ;;  %v111_v59 = vrot.slane %v82_v52, %v94_v47 }
  0x47   :  { %v116_v60 = vsel %vm115_vm0, %v87_v53, %v103_v57  ;;  %v117_v61 = vsel %vm115_vm0, %v91_v54, %v107_v58  ;;  %v118_v62 = vsel %vm115_vm0, %v95_v55, %v111_v59 }
  0x48   :  { %v122_v63 = vcombine.low %v116_v60, %v117_v61  ;;  %v136_v0 = vrot.slane %v118_v62, %v128_v56 }
  0x4a   :  { %v129_v1 = vrot.slane %v122_v63, %v128_v56 }
  0x4c   :  { %v137_v2 = vcombine.low %v129_v1, %v136_v0 }
  0x4e   :  { %139 = vst [vmem:[%s213_s2] sm:$0x3f] %v137_v2 }
  0x4f   :  { %144 = vsyncpa [#allocation3], 1 }

</bundles_post_ra>
